<compile_context>
chip_gen: v5e
topology: v5e:2x2
jax: 0.10.0
libtpu: 0.0.40
codegen_flags: <defaults>
</compile_context>

<pallas_src>
import functools

import jax
import jax.numpy as jnp
from jax.experimental import pallas as pl
from jax.experimental.pallas import tpu as pltpu

LANES = 128        # vreg lane width
CHUNK_ROWS = 512   # in-kernel compute chunk (256 KiB f32 temporaries)


def _device_kind():
    try:
        return jax.devices()[0].device_kind.lower()
    except Exception:
        return ""


def _pick_tm_max(kind):
    # Per-step row-tile ceiling, chosen so the double-buffered streaming
    # footprint (2 inputs x 2 buffers x tile) + small scratch stays under the
    # *default* scoped-VMEM limit of each generation.
    if "v2" in kind or "v3" in kind:
        return 1024      # 0.5 MiB/input/block -> 2 MiB streaming (16 MiB VMEM)
    if "v4" in kind or "v5" in kind:
        return 4096      # 2 MiB/input/block -> 8 MiB streaming (16 MiB scoped)
    if "v6" in kind or "v7" in kind or "tpu7" in kind:
        return 8192      # 4 MiB/input/block -> 16 MiB streaming (32 MiB scoped)
    return 2048          # unknown device: stay conservative


def _num_core_splits(kind):
    # v7x has 2 TensorCores per chip, each with its own HBM port; splitting the
    # row blocks across them ~2x's this HBM-bound reduction.  On 1-TC chips a
    # split is pure overhead, so keep it at 1.
    return 2 if ("v7" in kind or "tpu7" in kind) else 1


def _mse_kernel(yp_ref, yt_ref, out_ref, acc_ref, *, nsplit, steps, chunk,
                total_rows, mask_from_blk, needs_mask, inv_n):
    if nsplit > 1:
        c = pl.program_id(0)          # core-split axis (CORE_PARALLEL)
        i = pl.program_id(1)          # reduction axis  (ARBITRARY)
        last = pl.num_programs(1) - 1
    else:
        c = 0
        i = pl.program_id(0)
        last = pl.num_programs(0) - 1

    @pl.when(i == 0)
    def _():
        acc_ref[...] = jnp.zeros_like(acc_ref)

    tm, lanes = yp_ref.shape
    acc_rows = acc_ref.shape[0]
    nchunks = tm // chunk

    def chunk_sq_diff(r0):
        yp = yp_ref[pl.ds(r0, chunk), :].astype(jnp.float32)
        yt = yt_ref[pl.ds(r0, chunk), :].astype(jnp.float32)
        d = yt - yp
        return d * d

    def fold(x):
        # Leading-axis fold preserves the (8,128) sublane/lane tiling: pure VPU
        # vreg adds into the tiny resident accumulator (no XLU, no relayout).
        return jnp.sum(x.reshape(chunk // acc_rows, acc_rows, lanes), axis=0)

    def accum_plain(j, carry):
        r0 = pl.multiple_of(j * chunk, chunk)
        acc_ref[...] += fold(chunk_sq_diff(r0))
        return carry

    def run(body):
        if nchunks == 1:
            body(0, 0)                              # static, no loop
        else:
            jax.lax.fori_loop(0, nchunks, body, 0)  # stateful inner loop

    if needs_mask:
        blk = c * steps + i           # unclamped logical block index

        @pl.when(blk < mask_from_blk)
        def _():                      # bulk fast path: no mask work at all
            run(accum_plain)

        @pl.when(blk >= mask_from_blk)
        def _():
            # Block-local row mask:
            #  * partial edge block: rows at/after `rows_left` are OOB garbage
            #    read past the slab and must contribute zero;
            #  * clamped duplicate blocks of an uneven core split re-read the
            #    last real block; there rows_left <= 0, so everything is
            #    masked and nothing is double counted.
            # Zero padding inside valid rows already contributes 0, so no
            # per-lane mask is needed; block-local int32 indices cannot
            # overflow regardless of input size.
            rows_left = total_rows - blk * tm

            def accum_masked(j, carry):
                r0 = pl.multiple_of(j * chunk, chunk)
                row = jax.lax.broadcasted_iota(jnp.int32, (chunk, lanes), 0)
                keep = (r0 + row) < rows_left
                acc_ref[...] += fold(jnp.where(keep, chunk_sq_diff(r0), 0.0))
                return carry

            run(accum_masked)
    else:
        run(accum_plain)

    @pl.when(i == last)
    def _():
        # Single cross-lane reduce + 1/N scale per split, done once.
        out_ref[0, 0] = jnp.sum(acc_ref[...]) * inv_n


@jax.jit
def mse_loss(y_pred, y_true):
    assert y_pred.shape == y_true.shape
    n_true = int(y_pred.size)
    assert n_true > 0

    kind = _device_kind()
    tm_max = _pick_tm_max(kind)

    m = pl.cdiv(n_true, LANES)        # rows of the lane-major (m, 128) slab
    n_slab = m * LANES

    def to_slab(x):
        flat = x.reshape(-1)
        if n_slab != n_true:
            # Ragged element count only: minimal (<128 elem) zero pad so the
            # (m, 128) view exists.  Lane-aligned sizes (the common case) take
            # the pure zero-copy reshape below.
            # TODO(synk): for huge ragged inputs this pad is a full HBM copy;
            # a prefix kernel + wrapper-side tail sum would avoid it.
            flat = jnp.pad(flat, (0, n_slab - n_true))
        return flat.reshape(m, LANES)

    yp2 = to_slab(y_pred)
    yt2 = to_slab(y_true)

    # Row tile / compute chunk.  Tiles are multiples of CHUNK_ROWS (so the
    # inner loop has no remainder); tiny slabs use one full-extent block.
    if m >= CHUNK_ROWS:
        tm = min(tm_max, (m // CHUNK_ROWS) * CHUNK_ROWS)
        chunk = CHUNK_ROWS
    else:
        tm = m
        chunk = m
    acc_rows = 8 if chunk % 8 == 0 else chunk

    nblocks = pl.cdiv(m, tm)
    core_splits = _num_core_splits(kind)
    nsplit = core_splits if nblocks >= core_splits else 1
    steps = pl.cdiv(nblocks, nsplit)
    even_split = (nsplit * steps == nblocks)

    # Blocks with logical index >= mask_from_blk need the in-kernel row mask:
    # the partial edge block (if nblocks*tm != m) and any clamped duplicate
    # blocks of an uneven core split.  Zero-pad tails never need masking.
    mask_from_blk = nblocks - 1 if (nblocks * tm != m) else nblocks
    needs_mask = (nsplit * steps) > mask_from_blk

    if nsplit > 1:
        if even_split:
            def in_map(c, i):
                return (c * steps + i, 0)
        else:
            last_blk = nblocks - 1

            def in_map(c, i):
                # Clamp keeps the DMA in bounds; the duplicated block is fully
                # masked inside the kernel (rows_left <= 0), so it is never
                # double counted.
                return (jnp.minimum(c * steps + i, last_blk), 0)

        grid = (nsplit, steps)
        out_map = lambda c, i: (c, 0)
        dim_sem = (pltpu.CORE_PARALLEL, pltpu.ARBITRARY)
    else:
        def in_map(i):
            return (i, 0)

        grid = (steps,)
        out_map = lambda i: (0, 0)
        dim_sem = (pltpu.ARBITRARY,)

    kernel = functools.partial(
        _mse_kernel,
        nsplit=nsplit,
        steps=steps,
        chunk=chunk,
        total_rows=m,
        mask_from_blk=mask_from_blk,
        needs_mask=needs_mask,
        inv_n=1.0 / float(n_true),
    )

    bytes_accessed = (yp2.size * yp2.dtype.itemsize
                      + yt2.size * yt2.dtype.itemsize + 4 * nsplit)

    partials = pl.pallas_call(
        kernel,
        out_shape=jax.ShapeDtypeStruct((nsplit, 1), jnp.float32),
        grid_spec=pltpu.PrefetchScalarGridSpec(
            num_scalar_prefetch=0,
            grid=grid,
            in_specs=[
                pl.BlockSpec((tm, LANES), in_map),
                pl.BlockSpec((tm, LANES), in_map),
            ],
            out_specs=pl.BlockSpec(
                (1, 1), out_map, memory_space=pltpu.MemorySpace.SMEM),
            scratch_shapes=[pltpu.VMEM((acc_rows, LANES), jnp.float32)],
        ),
        compiler_params=pltpu.CompilerParams(dimension_semantics=dim_sem),
        cost_estimate=pl.CostEstimate(
            flops=3 * n_true, transcendentals=0, bytes_accessed=bytes_accessed),
    )(yp2, yt2)

    # Sum of per-split partial means (each already scaled by 1/N).
    return jnp.sum(partials)


if __name__ == "__main__":
    key = jax.random.PRNGKey(0)

    def check(shape, k, rtol=2e-5, atol=1e-6):
        k1, k2 = jax.random.split(k)
        y_pred = jax.random.normal(k1, shape, dtype=jnp.float32)
        y_true = jax.random.normal(k2, shape, dtype=jnp.float32)
        loss = mse_loss(y_pred, y_true)
        jax.block_until_ready(loss)
        ref = jnp.mean(jnp.square(y_true - y_pred))
        assert jnp.allclose(loss, ref, rtol=rtol, atol=atol), (shape, loss, ref)
        return loss

    keys = jax.random.split(key, 3)
    # Primary small shape (lane-aligned: zero-copy packing, single block).
    check((2, 4, 16, 16), keys[0])
    # Ragged element count: minimal zero-pad path, single tiny block.
    check((3, 5, 7), keys[1])
    # Multiple row blocks with a partial edge block: exercises the gated
    # row-mask fast/slow paths (and the core split when run on v7x).
    check((2, 5, 1024, 128), keys[2], rtol=1e-4)

    print("KERNEL_OK")
</pallas_src>

<mosaic_0001>
module attributes {stable_mosaic.version = 11 : i64} {
  func.func @_mse_kernel(%arg0: i32, %arg1: memref<16x128xf32, #tpu.memory_space<vmem>>, %arg2: memref<16x128xf32, #tpu.memory_space<vmem>>, %arg3: memref<1x1xf32, #tpu.memory_space<smem>>, %arg4: memref<8x128xf32, #tpu.memory_space<vmem>>) attributes {dimension_semantics = [#tpu.dimension_semantics<arbitrary>], iteration_bounds = array<i64: 1>, scalar_prefetch = 0 : i64, scratch_operands = 1 : i64, tpu.core_type = #tpu.core_type<tc>, window_params = [{transform_indices = @transform_0, window_bounds = array<i64: 16, 128>}, {transform_indices = @transform_1, window_bounds = array<i64: 16, 128>}, {transform_indices = @transform_2, window_bounds = array<i64: 1, 1>}]} {
    %c0_i32 = arith.constant 0 : i32
    %0 = arith.cmpi eq, %arg0, %c0_i32 : i32
    %1 = arith.extui %0 : i1 to i32
    %c0_i32_0 = arith.constant 0 : i32
    %2 = arith.cmpi ne, %1, %c0_i32_0 : i32
    scf.if %2 {
      %cst_9 = arith.constant 0.000000e+00 : f32
      %18 = vector.broadcast %cst_9 : f32 to vector<8x128xf32>
      %c0_10 = arith.constant 0 : index
      %c0_11 = arith.constant 0 : index
      %19 = vector.load %arg4[%c0_10, %c0_11] : memref<8x128xf32, #tpu.memory_space<vmem>>, vector<8x128xf32>
      tpu.vector_store %arg4[%c0_10, %c0_11], %18 {strides = array<i32>} : memref<8x128xf32, #tpu.memory_space<vmem>>, vector<8x128xf32>,
    } else {
    }
    %c0_i32_1 = arith.constant 0 : i32
    %3 = tpu.assume_multiple %c0_i32_1, 16 : i32
    %c0 = arith.constant 0 : index
    %c0_2 = arith.constant 0 : index
    %4 = vector.load %arg4[%c0, %c0_2] : memref<8x128xf32, #tpu.memory_space<vmem>>, vector<8x128xf32>
    %5 = arith.index_cast %3 : i32 to index
    %c0_3 = arith.constant 0 : index
    %6 = vector.load %arg1[%5, %c0_3] : memref<16x128xf32, #tpu.memory_space<vmem>>, vector<16x128xf32>
    %7 = arith.index_cast %3 : i32 to index
    %c0_4 = arith.constant 0 : index
    %8 = vector.load %arg2[%7, %c0_4] : memref<16x128xf32, #tpu.memory_space<vmem>>, vector<16x128xf32>
    %9 = arith.subf %8, %6 : vector<16x128xf32>
    %10 = arith.mulf %9, %9 : vector<16x128xf32>
    %11 = vector.shape_cast %10 : vector<16x128xf32> to vector<2x8x128xf32>
    %cst = arith.constant dense<0.000000e+00> : vector<8x128xf32>
    %12 = vector.multi_reduction <add>, %11, %cst [0] : vector<2x8x128xf32> to vector<8x128xf32>
    %13 = arith.addf %4, %12 : vector<8x128xf32>
    %c0_5 = arith.constant 0 : index
    %c0_6 = arith.constant 0 : index
    %14 = vector.load %arg4[%c0_5, %c0_6] : memref<8x128xf32, #tpu.memory_space<vmem>>, vector<8x128xf32>
    tpu.vector_store %arg4[%c0_5, %c0_6], %13 {strides = array<i32>} : memref<8x128xf32, #tpu.memory_space<vmem>>, vector<8x128xf32>,
    %c0_i32_7 = arith.constant 0 : i32
    %15 = arith.cmpi eq, %arg0, %c0_i32_7 : i32
    %16 = arith.extui %15 : i1 to i32
    %c0_i32_8 = arith.constant 0 : i32
    %17 = arith.cmpi ne, %16, %c0_i32_8 : i32
    scf.if %17 {
      %c0_9 = arith.constant 0 : index
      %c0_10 = arith.constant 0 : index
      %18 = vector.load %arg4[%c0_9, %c0_10] : memref<8x128xf32, #tpu.memory_space<vmem>>, vector<8x128xf32>
      %19 = vector.shape_cast %18 : vector<8x128xf32> to vector<1x8x128xf32>
      %cst_11 = arith.constant dense<0.000000e+00> : vector<1xf32>
      %20 = vector.multi_reduction <add>, %19, %cst_11 [1, 2] : vector<1x8x128xf32> to vector<1xf32>
      %21 = vector.shape_cast %20 : vector<1xf32> to vector<1x1x1xf32>
      %22 = vector.extract %21[0, 0, 0] : f32 from vector<1x1x1xf32>
      %cst_12 = arith.constant 4.8828125E-4 : f32
      %23 = arith.mulf %22, %cst_12 : f32
      %c0_13 = arith.constant 0 : index
      %c0_14 = arith.constant 0 : index
      %24 = memref.load %arg3[%c0_13, %c0_14] : memref<1x1xf32, #tpu.memory_space<smem>>
      memref.store %23, %arg3[%c0_13, %c0_14] : memref<1x1xf32, #tpu.memory_space<smem>>
    } else {
    }
    return
  }
  func.func @transform_0(%arg0: i32) -> (i32, i32) {
    %c0_i32 = arith.constant 0 : i32
    %c0_i32_0 = arith.constant 0 : i32
    return %arg0, %c0_i32 : i32, i32
  }
  func.func @transform_1(%arg0: i32) -> (i32, i32) {
    %c0_i32 = arith.constant 0 : i32
    %c0_i32_0 = arith.constant 0 : i32
    return %arg0, %c0_i32 : i32, i32
  }
  func.func @transform_2(%arg0: i32) -> (i32, i32) {
    %c0_i32 = arith.constant 0 : i32
    %c0_i32_0 = arith.constant 0 : i32
    %c0_i32_1 = arith.constant 0 : i32
    return %c0_i32, %c0_i32_0 : i32, i32
  }
}

</mosaic_0001>

<bundles_post_ra>
// kernel: mse_loss.1
= control target key start
LH: loop header
LB: loop body
LE: loop exit
PB: predicated region body
PF: predicated region fallthrough
CT: control target
= control target key end

     0   :  { %s108_s0 = inlined_call_operand.vmem [shape: f32[16,128], index: 0, kind: input, shape index: {}]   ;;  %s109_s1 = inlined_call_operand.vmem [shape: f32[16,128], index: 1, kind: input, shape index: {}]   ;;  %s110_s2 = inlined_call_operand.hbm [shape: f32[1,1], index: 2, kind: output, shape index: {}]  }
   0x1   :  { %v18_v0 = vld [vmem:[%s108_s0] sm:$0xff]  ;;  %v19_v1 = vld [vmem:[%s108_s0 + $0x8] sm:$0xff] }
   0x2   :  { %v20_v2 = vld [vmem:[%s109_s1] sm:$0xff]  ;;  %v21_v3 = vld [vmem:[%s109_s1 + $0x8] sm:$0xff] }
   0x3   :  { %v22_v4 = vsub.f32 %v20_v2, %v18_v0 }
   0x4   :  { %7 = vsyncpa [#allocation4], 0  ;;  %v23_v5 = vsub.f32 %v21_v3, %v19_v1  ;;  %s50_s18 = sshll.u32 %s110_s2, 4  ;;  %s77_s20 = smov [#allocation3]   ;;  %s51_s18 = int_to_ptr.hbm [resolvable:$true] %s50_s18 }
   0x5   :  { %v24_v6 = vmul.f32 %v22_v4, %v22_v4 }
   0x6   :  { %v25_v7 = vmul.f32 %v23_v5, %v23_v5 }
   0x8   :  { %v26_v8 = vadd.f32 %v25_v7, %v24_v6 }
   0xa   :  { %33 = vadd.xlane.f32.xlu0 %v26_v8 }
  0x7d   :  { %v34_v9 = vpop.xlane.xlu0 %33 }
  0x7e   :  { %v35_v10 = vrot.slane %v34_v9, 4 }
  0x80   :  { %v36_v11 = vadd.f32 %v35_v10, %v34_v9 }
  0x82   :  { %v37_v12 = vrot.slane %v36_v11, 2 }
  0x84   :  { %v38_v13 = vadd.f32 %v37_v12, %v36_v11 }
  0x86   :  { %v39_v14 = vrot.slane %v38_v13, 1 }
  0x88   :  { %v40_v15 = vadd.f32 %v39_v14, %v38_v13 }
  0x8a   :  { %60 = vpush %v40_v15 }
  0xbb   :  { %s61_s1 = spop %60 }
  0xbc   :  { %s42_s19 = smul.f32 0.00048828125, %s61_s1 }
  0xbe   :  { %44 = sst [smem:[#allocation3]] %s42_s19 }
  0xbf   :  { %53 = dma.smem_to_hbm %s77_s20, 16, %s51_s18, [#allocation4]  }
  0xc0   :  { %75 = dma.done.wait [#allocation4], 16  }
  0xc1   :  { %76 = vsyncadd [#allocation4], 4294967280 }
  0xc2   :  { %58 = sfence }
  0xc3   :  { %59 = vsyncpa [#allocation4], 1 }

</bundles_post_ra>
